<compile_context>
chip_gen: v5e
topology: v5e:2x2
jax: 0.10.0
libtpu: 0.0.40
codegen_flags: <defaults>
</compile_context>

<pallas_src>
import functools
import math

import jax
import jax.numpy as jnp
from jax.experimental import pallas as pl
from jax.experimental.pallas import tpu as pltpu

_LANE = 128  # TPU vreg lane width; last-dim tiles should be multiples of this.


def _round_up(x, m):
    return (x + m - 1) // m * m


# --------------------------------------------------------------------------- #
# Kernel
# --------------------------------------------------------------------------- #
def cma_kernel(audio_ref, text_ref, wa_ref, ba_ref, wt_ref, bt_ref,
               aat_ref, taa_ref, a2t_ref, t2a_ref, *,
               inv_scale, sa_real, st_real, approx_recip):
    """One grid step == one block of `Bblk` batch elements, fully VMEM-resident.

    wa_ref/wt_ref: fused (Hp, 3*Hp) projection weights, columns [q | k | v].
    ba_ref/bt_ref: matching (1, 3*Hp) f32 biases.
    """
    bblk, sa, hp = audio_ref.shape
    _, st, _ = text_ref.shape
    cdt = audio_ref.dtype            # MXU operand dtype (== input dtype)

    # ---- fused projections: one big MXU matmul per modality ----------------
    # Flatten (Bblk, S, Hp) -> (Bblk*S, Hp); S is a multiple of the sublane
    # packing and Hp a multiple of 128, so this reshape is tile-aligned.
    a_flat = audio_ref[...].reshape(bblk * sa, hp)
    t_flat = text_ref[...].reshape(bblk * st, hp)
    a_proj = jnp.dot(a_flat, wa_ref[...],
                     preferred_element_type=jnp.float32) + ba_ref[...]
    t_proj = jnp.dot(t_flat, wt_ref[...],
                     preferred_element_type=jnp.float32) + bt_ref[...]

    def split_qkv(proj, s):
        # Column slices are 128-aligned; reshape back to (bblk, s, hp) is
        # tile-aligned.  Cast to the compute dtype so the attention matmuls
        # run on the bf16 MXU path when the inputs are bf16 (no-op for f32).
        q = proj[:, 0 * hp:1 * hp].reshape(bblk, s, hp).astype(cdt)
        k = proj[:, 1 * hp:2 * hp].reshape(bblk, s, hp).astype(cdt)
        v = proj[:, 2 * hp:3 * hp].reshape(bblk, s, hp).astype(cdt)
        return q, k, v

    audio_q, audio_k, audio_v = split_qkv(a_proj, sa)
    text_q, text_k, text_v = split_qkv(t_proj, st)

    def pad_keys(x, rows_to):
        # Zero-pad the key axis (sublane dim, aligned boundary) up to a
        # multiple of 128 so energies / probabilities / attention stores are
        # fully lane dense.  Padded keys are masked to -inf below, so the
        # result is exact; MXU cost is unchanged (it tiles N/K in 128 anyway).
        pad = rows_to - x.shape[1]
        if pad == 0:
            return x
        zeros = jnp.zeros((x.shape[0], pad, x.shape[2]), dtype=x.dtype)
        return jnp.concatenate([x, zeros], axis=1)

    def attend(q, k, v, n_keys_real, attn_ref, out_ref):
        k_lane = attn_ref.shape[-1]                  # multiple of 128
        kp = pad_keys(k, k_lane)
        vp = pad_keys(v, k_lane)
        # Contract last dims of Q and K directly (no explicit K transpose).
        energy = jnp.einsum("bqh,bkh->bqk", q, kp,
                            preferred_element_type=jnp.float32) * inv_scale
        if k_lane > n_keys_real:                     # static condition
            key_idx = jax.lax.broadcasted_iota(jnp.int32, energy.shape, 2)
            energy = jnp.where(key_idx < n_keys_real, energy, -jnp.inf)
        # Numerically stable softmax in f32.
        m = jnp.max(energy, axis=-1, keepdims=True)
        p = jnp.exp(energy - m)
        s = jnp.sum(p, axis=-1, keepdims=True)
        if approx_recip:
            # bf16 path: push the divide onto the otherwise-idle EUP slot.
            attn = p * pl.reciprocal(s, approx=True)
        else:
            # f32 path: exact divide so outputs match the f32 reference.
            attn = p / s
        attended = jnp.einsum("bqk,bkh->bqh", attn.astype(cdt), vp,
                              preferred_element_type=jnp.float32)
        attn_ref[...] = attn.astype(attn_ref.dtype)
        out_ref[...] = attended.astype(out_ref.dtype)

    attend(audio_q, text_k, text_v, st_real, a2t_ref, aat_ref)   # audio -> text
    attend(text_q, audio_k, audio_v, sa_real, t2a_ref, taa_ref)  # text  -> audio


# --------------------------------------------------------------------------- #
# Generation-aware sizing heuristics
# --------------------------------------------------------------------------- #
def _vmem_capacity_bytes():
    try:
        info = pltpu.get_tpu_info()
        cap = int(getattr(info, "vmem_capacity_bytes", 0))
        if cap > 0:
            return cap
    except Exception:
        pass  # hardware query only; heuristics fall back to 128 MiB (v5e/v6e)
    return 128 * 1024 * 1024


def _budgets():
    cap = _vmem_capacity_bytes()
    if cap <= 64 * 1024 * 1024:             # v7x-class: 64 MiB per TensorCore
        act_budget = 8 * 1024 * 1024
        vmem_floor = 16 * 1024 * 1024
        vmem_cap = cap - 16 * 1024 * 1024   # leave headroom for compiler scratch
    else:                                    # v5e / v6e: 128 MiB physical
        act_budget = 20 * 1024 * 1024
        vmem_floor = 32 * 1024 * 1024
        vmem_cap = 64 * 1024 * 1024
    return act_budget, vmem_floor, vmem_cap


def _act_bytes(bblk, sa, st, sa_lane, st_lane, hp, itemsize):
    """Per-grid-step activation VMEM, including pipeline double-buffering."""
    io = 2 * bblk * (sa + st) * hp * itemsize                      # inputs (2 bufs)
    io += 2 * bblk * (sa + st) * hp * itemsize                     # attended outputs
    io += 2 * bblk * (sa * st_lane + st * sa_lane) * itemsize      # attention outputs
    live = bblk * (sa + st) * 3 * hp * 4                           # f32 fused projections
    live += bblk * (sa + st) * 3 * hp * itemsize                   # Q/K/V in compute dtype
    live += bblk * (st_lane + sa_lane) * hp * itemsize             # lane-padded K/V
    live += 2 * bblk * (sa * st_lane + st * sa_lane) * 4           # f32 energies + probs
    return io + live


def _pick_batch_block(batch, sa, st, sa_lane, st_lane, hp, itemsize, budget):
    """Largest divisor of `batch` that fits the budget while keeping the grid
    at >= 2 (preferably even) steps, so both v7x TensorCores get work and the
    input pipeline has something to overlap."""
    min_grid = 2 if batch >= 2 else 1
    feasible = []
    for cand in range(1, batch + 1):
        if batch % cand or batch // cand < min_grid:
            continue
        if cand * max(sa, st) > 1024:        # MXU M-fill saturates well below this
            continue
        if _act_bytes(cand, sa, st, sa_lane, st_lane, hp, itemsize) > budget:
            continue
        feasible.append(cand)
    if not feasible:
        return 1
    even = [c for c in feasible if (batch // c) % 2 == 0]
    return max(even) if even else max(feasible)


def _vmem_limit_bytes(bblk, sa, st, sa_lane, st_lane, hp, itemsize,
                      single_buffer_weights, vmem_floor, vmem_cap):
    wbuf = 1 if single_buffer_weights else 2
    weights = wbuf * 2 * (hp * 3 * hp * itemsize + 3 * hp * 4)
    acts = _act_bytes(bblk, sa, st, sa_lane, st_lane, hp, itemsize)
    est = int(1.5 * (weights + acts))
    return int(min(max(est, vmem_floor), vmem_cap))


def _const_spec(shape, single_buffer):
    """BlockSpec for a grid-invariant (constant index_map) operand."""
    index_map = lambda b: (0,) * len(shape)
    if single_buffer:
        # Same block every grid step: single-buffer it so it occupies VMEM
        # once instead of being double-buffered by the pipeline.
        return pl.BlockSpec(shape, index_map,
                            pipeline_mode=pl.Buffered(buffer_count=1))
    return pl.BlockSpec(shape, index_map)


# --------------------------------------------------------------------------- #
# Wrapper
# --------------------------------------------------------------------------- #
@functools.partial(jax.jit, static_argnames=("single_buffer_weights",))
def _cma_impl(audio, text, params, single_buffer_weights):
    B, Sa, H = audio.shape
    _, St, _ = text.shape
    dtype = audio.dtype
    itemsize = jnp.dtype(dtype).itemsize
    Hp = max(_round_up(H, _LANE), _LANE)       # lane-dense hidden dim
    seq_mult = max(8, 32 // itemsize)          # sublane packing: 8 f32, 16 bf16
    Sa_p = _round_up(Sa, seq_mult)
    St_p = _round_up(St, seq_mult)
    Sa_lane = _round_up(Sa_p, _LANE)           # key width for t2a attention
    St_lane = _round_up(St_p, _LANE)           # key width for a2t attention

    def pad2(x, rows, cols):
        return jnp.pad(x, ((0, rows - x.shape[0]), (0, cols - x.shape[1])))

    # Fused QKV weights (columns [q|k|v]) in the activation dtype; biases stay
    # f32 so they add exactly onto the f32 MXU accumulator.
    wa = jnp.concatenate([pad2(params["w" + n], Hp, Hp)
                          for n in ("qa", "ka", "va")], axis=1).astype(dtype)
    wt = jnp.concatenate([pad2(params["w" + n], Hp, Hp)
                          for n in ("qt", "kt", "vt")], axis=1).astype(dtype)
    ba = jnp.concatenate([pad2(params["b" + n], 1, Hp)
                          for n in ("qa", "ka", "va")], axis=1).astype(jnp.float32)
    bt = jnp.concatenate([pad2(params["b" + n], 1, Hp)
                          for n in ("qt", "kt", "vt")], axis=1).astype(jnp.float32)

    # Zero-padding is exact: padded hidden cols are zero on both matmul
    # operands, padded key rows are masked to -inf in-kernel, and padded query
    # rows are sliced off below.
    audio_p = jnp.pad(audio, ((0, 0), (0, Sa_p - Sa), (0, Hp - H)))
    text_p = jnp.pad(text, ((0, 0), (0, St_p - St), (0, Hp - H)))

    act_budget, vmem_floor, vmem_cap = _budgets()
    bblk = _pick_batch_block(B, Sa_p, St_p, Sa_lane, St_lane, Hp, itemsize,
                             act_budget)
    grid = (B // bblk,)

    # NOTE: if profiling on v5e shows the per-step input DMA exposed, bump the
    # two activation in_specs below to pipeline_mode=pl.Buffered(3) and sweep.
    in_specs = [
        pl.BlockSpec((bblk, Sa_p, Hp), lambda b: (b, 0, 0)),
        pl.BlockSpec((bblk, St_p, Hp), lambda b: (b, 0, 0)),
        _const_spec((Hp, 3 * Hp), single_buffer_weights),
        _const_spec((1, 3 * Hp), single_buffer_weights),
        _const_spec((Hp, 3 * Hp), single_buffer_weights),
        _const_spec((1, 3 * Hp), single_buffer_weights),
    ]
    out_specs = (
        pl.BlockSpec((bblk, Sa_p, Hp), lambda b: (b, 0, 0)),
        pl.BlockSpec((bblk, St_p, Hp), lambda b: (b, 0, 0)),
        pl.BlockSpec((bblk, Sa_p, St_lane), lambda b: (b, 0, 0)),
        pl.BlockSpec((bblk, St_p, Sa_lane), lambda b: (b, 0, 0)),
    )
    out_shape = (
        jax.ShapeDtypeStruct((B, Sa_p, Hp), dtype),      # audio_attended_text
        jax.ShapeDtypeStruct((B, St_p, Hp), dtype),      # text_attended_audio
        jax.ShapeDtypeStruct((B, Sa_p, St_lane), dtype),  # a2t attention
        jax.ShapeDtypeStruct((B, St_p, Sa_lane), dtype),  # t2a attention
    )

    kernel = functools.partial(
        cma_kernel,
        inv_scale=1.0 / math.sqrt(H),
        sa_real=Sa, st_real=St,
        approx_recip=(dtype != jnp.float32),
    )
    aat, taa, a2t, t2a = pl.pallas_call(
        kernel,
        out_shape=out_shape,
        grid=grid,
        in_specs=in_specs,
        out_specs=out_specs,
        compiler_params=pltpu.CompilerParams(
            dimension_semantics=("parallel",),
            vmem_limit_bytes=_vmem_limit_bytes(
                bblk, Sa_p, St_p, Sa_lane, St_lane, Hp, itemsize,
                single_buffer_weights, vmem_floor, vmem_cap),
        ),
    )(audio_p, text_p, wa, ba, wt, bt)

    # Strip all padding (hidden dim, query rows, key columns).
    return (aat[:, :Sa, :H], taa[:, :St, :H],
            a2t[:, :Sa, :St], t2a[:, :St, :Sa])


def cross_modal_attention(audio_features, text_features, params):
    """audio_features: (B, Sa, H); text_features: (B, St, H).

    params: dict with keys wqa,bqa, wkt,bkt, wvt,bvt, wqt,bqt, wka,bka, wva,bva.
    Weights are (H, H) [in, out] (PyTorch W transposed); biases are (1, H).
    Returns (audio_attended_text, text_attended_audio, a2t_attention, t2a_attention).
    """
    try:
        return _cma_impl(audio_features, text_features, params,
                         single_buffer_weights=True)
    except (pltpu.LoweringException, NotImplementedError, ValueError, TypeError):
        # Only plausible cause: pl.Buffered(buffer_count=1) unsupported by this
        # jax version for the top-level pipeline.  Genuine errors re-raise from
        # the (unguarded) fallback path below, so they are not masked.
        # TODO(synk): replace this fallback with memory_space=pl.ANY weights +
        # a one-time make_async_copy into VMEM scratch so large fused weights
        # are never double-buffered on v7x.
        return _cma_impl(audio_features, text_features, params,
                         single_buffer_weights=False)


# --------------------------------------------------------------------------- #
# Reference + test harness
# --------------------------------------------------------------------------- #
def make_params(key, hidden_dim, dtype=jnp.float32):
    """Deterministic synthetic parameters (PyTorch-Linear shapes, stored transposed)."""
    params = {}
    names = ("qa", "kt", "vt", "qt", "ka", "va")
    keys = jax.random.split(key, 2 * len(names))
    bound = 1.0 / math.sqrt(hidden_dim)
    for i, name in enumerate(names):
        wk, bk = keys[2 * i], keys[2 * i + 1]
        params["w" + name] = jax.random.uniform(
            wk, (hidden_dim, hidden_dim), dtype, -bound, bound)
        params["b" + name] = jax.random.uniform(
            bk, (1, hidden_dim), dtype, -bound, bound)
    return params


def reference(audio, text, params):
    """Pure-JAX reference mirroring the PyTorch forward."""
    H = audio.shape[-1]
    scale = jnp.sqrt(jnp.float32(H))

    def lin(x, w, b):
        return x @ w + b

    aq = lin(audio, params["wqa"], params["bqa"])
    tk = lin(text, params["wkt"], params["bkt"])
    tv = lin(text, params["wvt"], params["bvt"])
    a2t = jax.nn.softmax(jnp.einsum("bqh,bkh->bqk", aq, tk) / scale, axis=-1)
    aat = jnp.einsum("bqk,bkh->bqh", a2t, tv)

    tq = lin(text, params["wqt"], params["bqt"])
    ak = lin(audio, params["wka"], params["bka"])
    av = lin(audio, params["wva"], params["bva"])
    t2a = jax.nn.softmax(jnp.einsum("bqh,bkh->bqk", tq, ak) / scale, axis=-1)
    taa = jnp.einsum("bqk,bkh->bqh", t2a, av)
    return aat, taa, a2t, t2a


if __name__ == "__main__":
    B, Sa, St, H = 2, 8, 16, 32
    key = jax.random.PRNGKey(0)
    k_a, k_t, k_p = jax.random.split(key, 3)

    audio = jax.random.normal(k_a, (B, Sa, H), jnp.float32)
    text = jax.random.normal(k_t, (B, St, H), jnp.float32)
    params = make_params(k_p, H)

    outs = cross_modal_attention(audio, text, params)
    outs = jax.block_until_ready(outs)

    refs = reference(audio, text, params)
    names = ("audio_attended_text", "text_attended_audio", "a2t", "t2a")
    for name, o, r in zip(names, outs, refs):
        assert o.shape == r.shape, (name, o.shape, r.shape)
        err = float(jnp.max(jnp.abs(o.astype(jnp.float32) - r.astype(jnp.float32))))
        assert err < 1e-4, (name, err)

    print("KERNEL_OK")
</pallas_src>

<mosaic_0001>
module attributes {stable_mosaic.version = 11 : i64} {
  func.func @cma_kernel(%arg0: i32, %arg1: memref<1x8x128xf32, #tpu.memory_space<vmem>>, %arg2: memref<1x16x128xf32, #tpu.memory_space<vmem>>, %arg3: memref<128x384xf32, #tpu.memory_space<vmem>>, %arg4: memref<1x384xf32, #tpu.memory_space<vmem>>, %arg5: memref<128x384xf32, #tpu.memory_space<vmem>>, %arg6: memref<1x384xf32, #tpu.memory_space<vmem>>, %arg7: memref<1x8x128xf32, #tpu.memory_space<vmem>>, %arg8: memref<1x16x128xf32, #tpu.memory_space<vmem>>, %arg9: memref<1x8x128xf32, #tpu.memory_space<vmem>>, %arg10: memref<1x16x128xf32, #tpu.memory_space<vmem>>) attributes {dimension_semantics = [#tpu.dimension_semantics<parallel>], iteration_bounds = array<i64: 2>, scalar_prefetch = 0 : i64, scratch_operands = 0 : i64, tpu.core_type = #tpu.core_type<tc>, window_params = [{transform_indices = @transform_0, window_bounds = array<i64: 1, 8, 128>}, {transform_indices = @transform_1, window_bounds = array<i64: 1, 16, 128>}, {pipeline_mode = #tpu.pipeline_mode<synchronous>, transform_indices = @transform_2, window_bounds = array<i64: 128, 384>}, {pipeline_mode = #tpu.pipeline_mode<synchronous>, transform_indices = @transform_3, window_bounds = array<i64: 1, 384>}, {pipeline_mode = #tpu.pipeline_mode<synchronous>, transform_indices = @transform_4, window_bounds = array<i64: 128, 384>}, {pipeline_mode = #tpu.pipeline_mode<synchronous>, transform_indices = @transform_5, window_bounds = array<i64: 1, 384>}, {transform_indices = @transform_6, window_bounds = array<i64: 1, 8, 128>}, {transform_indices = @transform_7, window_bounds = array<i64: 1, 16, 128>}, {transform_indices = @transform_8, window_bounds = array<i64: 1, 8, 128>}, {transform_indices = @transform_9, window_bounds = array<i64: 1, 16, 128>}]} {
    %c0 = arith.constant 0 : index
    %c0_0 = arith.constant 0 : index
    %c0_1 = arith.constant 0 : index
    %0 = vector.load %arg1[%c0, %c0_0, %c0_1] : memref<1x8x128xf32, #tpu.memory_space<vmem>>, vector<1x8x128xf32>
    %1 = vector.shape_cast %0 : vector<1x8x128xf32> to vector<8x128xf32>
    %c0_2 = arith.constant 0 : index
    %c0_3 = arith.constant 0 : index
    %c0_4 = arith.constant 0 : index
    %2 = vector.load %arg2[%c0_2, %c0_3, %c0_4] : memref<1x16x128xf32, #tpu.memory_space<vmem>>, vector<1x16x128xf32>
    %3 = vector.shape_cast %2 : vector<1x16x128xf32> to vector<16x128xf32>
    %c0_5 = arith.constant 0 : index
    %c0_6 = arith.constant 0 : index
    %4 = vector.load %arg3[%c0_5, %c0_6] : memref<128x384xf32, #tpu.memory_space<vmem>>, vector<128x384xf32>
    %cst = arith.constant dense<0.000000e+00> : vector<8x384xf32>
    %5 = tpu.matmul %1, %4, %cst {dimension_numbers = #tpu.dot_dimension_numbers<[1], [0], [0], [1], [0, 0, 1, 1], [], []>} : vector<8x128xf32>, vector<128x384xf32>, vector<8x384xf32> -> vector<8x384xf32>
    %c0_7 = arith.constant 0 : index
    %c0_8 = arith.constant 0 : index
    %6 = vector.load %arg4[%c0_7, %c0_8] : memref<1x384xf32, #tpu.memory_space<vmem>>, vector<1x384xf32>
    %7 = vector.broadcast %6 : vector<1x384xf32> to vector<8x384xf32>
    %8 = arith.addf %5, %7 : vector<8x384xf32>
    %c0_9 = arith.constant 0 : index
    %c0_10 = arith.constant 0 : index
    %9 = vector.load %arg5[%c0_9, %c0_10] : memref<128x384xf32, #tpu.memory_space<vmem>>, vector<128x384xf32>
    %cst_11 = arith.constant dense<0.000000e+00> : vector<16x384xf32>
    %10 = tpu.matmul %3, %9, %cst_11 {dimension_numbers = #tpu.dot_dimension_numbers<[1], [0], [0], [1], [0, 0, 1, 1], [], []>} : vector<16x128xf32>, vector<128x384xf32>, vector<16x384xf32> -> vector<16x384xf32>
    %c0_12 = arith.constant 0 : index
    %c0_13 = arith.constant 0 : index
    %11 = vector.load %arg6[%c0_12, %c0_13] : memref<1x384xf32, #tpu.memory_space<vmem>>, vector<1x384xf32>
    %12 = vector.broadcast %11 : vector<1x384xf32> to vector<16x384xf32>
    %13 = arith.addf %10, %12 : vector<16x384xf32>
    %14 = vector.extract_strided_slice %8 {offsets = [0, 0], sizes = [8, 128], strides = [1, 1]} : vector<8x384xf32> to vector<8x128xf32>
    %15 = vector.shape_cast %14 : vector<8x128xf32> to vector<1x8x128xf32>
    %16 = vector.extract_strided_slice %8 {offsets = [0, 128], sizes = [8, 128], strides = [1, 1]} : vector<8x384xf32> to vector<8x128xf32>
    %17 = vector.shape_cast %16 : vector<8x128xf32> to vector<1x8x128xf32>
    %18 = vector.extract_strided_slice %8 {offsets = [0, 256], sizes = [8, 128], strides = [1, 1]} : vector<8x384xf32> to vector<8x128xf32>
    %19 = vector.shape_cast %18 : vector<8x128xf32> to vector<1x8x128xf32>
    %20 = vector.extract_strided_slice %13 {offsets = [0, 0], sizes = [16, 128], strides = [1, 1]} : vector<16x384xf32> to vector<16x128xf32>
    %21 = vector.shape_cast %20 : vector<16x128xf32> to vector<1x16x128xf32>
    %22 = vector.extract_strided_slice %13 {offsets = [0, 128], sizes = [16, 128], strides = [1, 1]} : vector<16x384xf32> to vector<16x128xf32>
    %23 = vector.shape_cast %22 : vector<16x128xf32> to vector<1x16x128xf32>
    %24 = vector.extract_strided_slice %13 {offsets = [0, 256], sizes = [16, 128], strides = [1, 1]} : vector<16x384xf32> to vector<16x128xf32>
    %25 = vector.shape_cast %24 : vector<16x128xf32> to vector<1x16x128xf32>
    %cst_14 = arith.constant 0.000000e+00 : f32
    %26 = vector.broadcast %cst_14 : f32 to vector<1x112x128xf32>
    %27 = tpu.concatenate %23, %26 in 1 : vector<1x16x128xf32>, vector<1x112x128xf32> -> vector<1x128x128xf32>
    %cst_15 = arith.constant 0.000000e+00 : f32
    %28 = vector.broadcast %cst_15 : f32 to vector<1x112x128xf32>
    %29 = tpu.concatenate %25, %28 in 1 : vector<1x16x128xf32>, vector<1x112x128xf32> -> vector<1x128x128xf32>
    "tpu.trace_start"() <{level = 10 : i32, message = "bqh,bkh->bqk"}> : () -> ()
    %cst_16 = arith.constant dense<0.000000e+00> : vector<1x8x128xf32>
    %30 = tpu.matmul %15, %27, %cst_16 {dimension_numbers = #tpu.dot_dimension_numbers<[2], [2], [1], [1], [0, 0, 0, 1, 1, 1], [0], [0]>} : vector<1x8x128xf32>, vector<1x128x128xf32>, vector<1x8x128xf32> -> vector<1x8x128xf32>
    "tpu.trace_stop"() : () -> ()
    %cst_17 = arith.constant 0.176776692 : f32
    %31 = vector.broadcast %cst_17 : f32 to vector<1x8x128xf32>
    %32 = arith.mulf %30, %31 : vector<1x8x128xf32>
    %33 = tpu.iota {dimensions = array<i32: 2>} : vector<1x8x128xi32>
    %c16_i32 = arith.constant 16 : i32
    %34 = vector.broadcast %c16_i32 : i32 to vector<1x8x128xi32>
    %35 = arith.cmpi slt, %33, %34 : vector<1x8x128xi32>
    %cst_18 = arith.constant 0xFF800000 : f32
    %36 = vector.broadcast %cst_18 : f32 to vector<1x8x128xf32>
    %37 = arith.select %35, %32, %36 : vector<1x8x128xi1>, vector<1x8x128xf32>
    %cst_19 = arith.constant dense<0xFF800000> : vector<1x8xf32>
    %38 = vector.multi_reduction <maximumf>, %37, %cst_19 [2] : vector<1x8x128xf32> to vector<1x8xf32>
    %39 = vector.shape_cast %38 : vector<1x8xf32> to vector<1x8x1xf32>
    %40 = vector.broadcast %39 : vector<1x8x1xf32> to vector<1x8x128xf32>
    %41 = arith.subf %37, %40 : vector<1x8x128xf32>
    %42 = math.exp %41 : vector<1x8x128xf32>
    %cst_20 = arith.constant dense<0.000000e+00> : vector<1x8xf32>
    %43 = vector.multi_reduction <add>, %42, %cst_20 [2] : vector<1x8x128xf32> to vector<1x8xf32>
    %44 = vector.shape_cast %43 : vector<1x8xf32> to vector<1x8x1xf32>
    %45 = vector.broadcast %44 : vector<1x8x1xf32> to vector<1x8x128xf32>
    %46 = arith.divf %42, %45 : vector<1x8x128xf32>
    "tpu.trace_start"() <{level = 10 : i32, message = "bqk,bkh->bqh"}> : () -> ()
    %cst_21 = arith.constant dense<0.000000e+00> : vector<1x8x128xf32>
    %47 = tpu.matmul %46, %29, %cst_21 {dimension_numbers = #tpu.dot_dimension_numbers<[2], [1], [1], [2], [0, 0, 0, 1, 1, 2], [0], [0]>} : vector<1x8x128xf32>, vector<1x128x128xf32>, vector<1x8x128xf32> -> vector<1x8x128xf32>
    "tpu.trace_stop"() : () -> ()
    %c0_22 = arith.constant 0 : index
    %c0_23 = arith.constant 0 : index
    %c0_24 = arith.constant 0 : index
    %48 = vector.load %arg9[%c0_22, %c0_23, %c0_24] : memref<1x8x128xf32, #tpu.memory_space<vmem>>, vector<1x8x128xf32>
    tpu.vector_store %arg9[%c0_22, %c0_23, %c0_24], %46 {strides = array<i32>} : memref<1x8x128xf32, #tpu.memory_space<vmem>>, vector<1x8x128xf32>,
    %c0_25 = arith.constant 0 : index
    %c0_26 = arith.constant 0 : index
    %c0_27 = arith.constant 0 : index
    %49 = vector.load %arg7[%c0_25, %c0_26, %c0_27] : memref<1x8x128xf32, #tpu.memory_space<vmem>>, vector<1x8x128xf32>
    tpu.vector_store %arg7[%c0_25, %c0_26, %c0_27], %47 {strides = array<i32>} : memref<1x8x128xf32, #tpu.memory_space<vmem>>, vector<1x8x128xf32>,
    %cst_28 = arith.constant 0.000000e+00 : f32
    %50 = vector.broadcast %cst_28 : f32 to vector<1x120x128xf32>
    %51 = tpu.concatenate %17, %50 in 1 : vector<1x8x128xf32>, vector<1x120x128xf32> -> vector<1x128x128xf32>
    %cst_29 = arith.constant 0.000000e+00 : f32
    %52 = vector.broadcast %cst_29 : f32 to vector<1x120x128xf32>
    %53 = tpu.concatenate %19, %52 in 1 : vector<1x8x128xf32>, vector<1x120x128xf32> -> vector<1x128x128xf32>
    "tpu.trace_start"() <{level = 10 : i32, message = "bqh,bkh->bqk"}> : () -> ()
    %cst_30 = arith.constant dense<0.000000e+00> : vector<1x16x128xf32>
    %54 = tpu.matmul %21, %51, %cst_30 {dimension_numbers = #tpu.dot_dimension_numbers<[2], [2], [1], [1], [0, 0, 0, 1, 1, 1], [0], [0]>} : vector<1x16x128xf32>, vector<1x128x128xf32>, vector<1x16x128xf32> -> vector<1x16x128xf32>
    "tpu.trace_stop"() : () -> ()
    %cst_31 = arith.constant 0.176776692 : f32
    %55 = vector.broadcast %cst_31 : f32 to vector<1x16x128xf32>
    %56 = arith.mulf %54, %55 : vector<1x16x128xf32>
    %57 = tpu.iota {dimensions = array<i32: 2>} : vector<1x16x128xi32>
    %c8_i32 = arith.constant 8 : i32
    %58 = vector.broadcast %c8_i32 : i32 to vector<1x16x128xi32>
    %59 = arith.cmpi slt, %57, %58 : vector<1x16x128xi32>
    %cst_32 = arith.constant 0xFF800000 : f32
    %60 = vector.broadcast %cst_32 : f32 to vector<1x16x128xf32>
    %61 = arith.select %59, %56, %60 : vector<1x16x128xi1>, vector<1x16x128xf32>
    %cst_33 = arith.constant dense<0xFF800000> : vector<1x16xf32>
    %62 = vector.multi_reduction <maximumf>, %61, %cst_33 [2] : vector<1x16x128xf32> to vector<1x16xf32>
    %63 = vector.shape_cast %62 : vector<1x16xf32> to vector<1x16x1xf32>
    %64 = vector.broadcast %63 : vector<1x16x1xf32> to vector<1x16x128xf32>
    %65 = arith.subf %61, %64 : vector<1x16x128xf32>
    %66 = math.exp %65 : vector<1x16x128xf32>
    %cst_34 = arith.constant dense<0.000000e+00> : vector<1x16xf32>
    %67 = vector.multi_reduction <add>, %66, %cst_34 [2] : vector<1x16x128xf32> to vector<1x16xf32>
    %68 = vector.shape_cast %67 : vector<1x16xf32> to vector<1x16x1xf32>
    %69 = vector.broadcast %68 : vector<1x16x1xf32> to vector<1x16x128xf32>
    %70 = arith.divf %66, %69 : vector<1x16x128xf32>
    "tpu.trace_start"() <{level = 10 : i32, message = "bqk,bkh->bqh"}> : () -> ()
    %cst_35 = arith.constant dense<0.000000e+00> : vector<1x16x128xf32>
    %71 = tpu.matmul %70, %53, %cst_35 {dimension_numbers = #tpu.dot_dimension_numbers<[2], [1], [1], [2], [0, 0, 0, 1, 1, 2], [0], [0]>} : vector<1x16x128xf32>, vector<1x128x128xf32>, vector<1x16x128xf32> -> vector<1x16x128xf32>
    "tpu.trace_stop"() : () -> ()
    %c0_36 = arith.constant 0 : index
    %c0_37 = arith.constant 0 : index
    %c0_38 = arith.constant 0 : index
    %72 = vector.load %arg10[%c0_36, %c0_37, %c0_38] : memref<1x16x128xf32, #tpu.memory_space<vmem>>, vector<1x16x128xf32>
    tpu.vector_store %arg10[%c0_36, %c0_37, %c0_38], %70 {strides = array<i32>} : memref<1x16x128xf32, #tpu.memory_space<vmem>>, vector<1x16x128xf32>,
    %c0_39 = arith.constant 0 : index
    %c0_40 = arith.constant 0 : index
    %c0_41 = arith.constant 0 : index
    %73 = vector.load %arg8[%c0_39, %c0_40, %c0_41] : memref<1x16x128xf32, #tpu.memory_space<vmem>>, vector<1x16x128xf32>
    tpu.vector_store %arg8[%c0_39, %c0_40, %c0_41], %71 {strides = array<i32>} : memref<1x16x128xf32, #tpu.memory_space<vmem>>, vector<1x16x128xf32>,
    return
  }
  func.func @transform_0(%arg0: i32) -> (i32, i32, i32) {
    %c0_i32 = arith.constant 0 : i32
    %c0_i32_0 = arith.constant 0 : i32
    %c0_i32_1 = arith.constant 0 : i32
    return %arg0, %c0_i32, %c0_i32_0 : i32, i32, i32
  }
  func.func @transform_1(%arg0: i32) -> (i32, i32, i32) {
    %c0_i32 = arith.constant 0 : i32
    %c0_i32_0 = arith.constant 0 : i32
    %c0_i32_1 = arith.constant 0 : i32
    return %arg0, %c0_i32, %c0_i32_0 : i32, i32, i32
  }
  func.func @transform_2(%arg0: i32) -> (i32, i32) {
    %c0_i32 = arith.constant 0 : i32
    %c0_i32_0 = arith.constant 0 : i32
    %c0_i32_1 = arith.constant 0 : i32
    return %c0_i32, %c0_i32_0 : i32, i32
  }
  func.func @transform_3(%arg0: i32) -> (i32, i32) {
    %c0_i32 = arith.constant 0 : i32
    %c0_i32_0 = arith.constant 0 : i32
    %c0_i32_1 = arith.constant 0 : i32
    return %c0_i32, %c0_i32_0 : i32, i32
  }
  func.func @transform_4(%arg0: i32) -> (i32, i32) {
    %c0_i32 = arith.constant 0 : i32
    %c0_i32_0 = arith.constant 0 : i32
    %c0_i32_1 = arith.constant 0 : i32
    return %c0_i32, %c0_i32_0 : i32, i32
  }
  func.func @transform_5(%arg0: i32) -> (i32, i32) {
    %c0_i32 = arith.constant 0 : i32
    %c0_i32_0 = arith.constant 0 : i32
    %c0_i32_1 = arith.constant 0 : i32
    return %c0_i32, %c0_i32_0 : i32, i32
  }
  func.func @transform_6(%arg0: i32) -> (i32, i32, i32) {
    %c0_i32 = arith.constant 0 : i32
    %c0_i32_0 = arith.constant 0 : i32
    %c0_i32_1 = arith.constant 0 : i32
    return %arg0, %c0_i32, %c0_i32_0 : i32, i32, i32
  }
  func.func @transform_7(%arg0: i32) -> (i32, i32, i32) {
    %c0_i32 = arith.constant 0 : i32
    %c0_i32_0 = arith.constant 0 : i32
    %c0_i32_1 = arith.constant 0 : i32
    return %arg0, %c0_i32, %c0_i32_0 : i32, i32, i32
  }
  func.func @transform_8(%arg0: i32) -> (i32, i32, i32) {
    %c0_i32 = arith.constant 0 : i32
    %c0_i32_0 = arith.constant 0 : i32
    %c0_i32_1 = arith.constant 0 : i32
    return %arg0, %c0_i32, %c0_i32_0 : i32, i32, i32
  }
  func.func @transform_9(%arg0: i32) -> (i32, i32, i32) {
    %c0_i32 = arith.constant 0 : i32
    %c0_i32_0 = arith.constant 0 : i32
    %c0_i32_1 = arith.constant 0 : i32
    return %arg0, %c0_i32, %c0_i32_0 : i32, i32, i32
  }
}

</mosaic_0001>

<bundles_post_ra>
// kernel: _cma_impl.1
= control target key start
LH: loop header
LB: loop body
LE: loop exit
PB: predicated region body
PF: predicated region fallthrough
CT: control target
= control target key end

     0   :  { %s1745_s0 = inlined_call_operand.vmem [shape: f32[2,8,128], index: 0, kind: input, shape index: {}]   ;;  %s1746_s1 = inlined_call_operand.vmem [shape: f32[2,16,128], index: 1, kind: input, shape index: {}]   ;;  %s1747_s2 = inlined_call_operand.vmem [shape: f32[128,384], index: 2, kind: input, shape index: {}]   ;;  %s1748_s3 = inlined_call_operand.vmem [shape: f32[1,384], index: 3, kind: input, shape index: {}]   ;;  %s1749_s4 = inlined_call_operand.vmem [shape: f32[128,384], index: 4, kind: input, shape index: {}]   ;;  %s1750_s5 = inlined_call_operand.vmem [shape: f32[1,384], index: 5, kind: input, shape index: {}]   ;;  %s1751_s6 = inlined_call_operand.hbm [shape: f32[2,8,128], index: 6, kind: output, shape index: {0}]   ;;  %s1752_s7 = inlined_call_operand.hbm [shape: f32[2,16,128], index: 7, kind: output, shape index: {1}]   ;;  %s1753_s8 = inlined_call_operand.hbm [shape: f32[2,8,128], index: 8, kind: output, shape index: {2}]   ;;  %s1754_s9 = inlined_call_operand.vmem [shape: f32[2,16,128], index: 9, kind: output, shape index: {3}]  }
   0x1   :  { %1757 = sst [smem:[#allocation11_spill]] %s1745_s0 }
   0x2   :  { %1758 = sst [smem:[#allocation12_spill]] %s1746_s1 }
   0x3   :  { %1759 = sst [smem:[#allocation13_spill]] %s1747_s2 }
   0x4   :  { %1760 = sst [smem:[#allocation14_spill]] %s1748_s3 }
   0x5   :  { %1761 = sst [smem:[#allocation15_spill]] %s1749_s4 }
   0x6   :  { %15 = vsyncpa [#allocation3], 0 }
   0x7   :  { %17 = vsyncpa [#allocation3 + $0x1], 0 }
   0x8   :  { %18 = vsyncpa [#allocation5], 0 }
   0x9   :  { %20 = vsyncpa [#allocation5 + $0x1], 0  ;;  %s1277_s30 = smov 0   ;;  %s1279_s10 = smov 0  }
   0xa   :  { %s1281_s11 = smov 0   ;;  %s1283_s12 = smov 0  }
   0xb LB: > { %1762 = sst [smem:[#allocation9_spill]] %s1219_s11  ;;  %s1298_s13 = sadd.s32 4294967295, %s1223_s12   ;;  %s1223_s12 = sphi %s1283_s12, %s1778_s12   ;;  %s1219_s11 = sphi %s1281_s11, %s1775_s11   ;;  %s1215_s10 = sphi %s1279_s10, %s1777_s10   ;;  %s1211_s30 = sphi %s1277_s30, %s1776_s30  }
   0xc   : > { %s1755_s14 = sadd.s32 4294967294, %s1223_s12   ;;  %s1302_s15 = sadd.s32 1, %s1223_s12  }
   0xd   : > { %s169_s16 = sadd.s32 1, %s1219_s11  ;;  %s166_s17 = ssub.s32 %s1223_s12, %s1302_s15 }
   0xe   : > { %p179_p0 = scmp.ne.s32.totalorder %s1219_s11, %s1215_s10  ;;  %p167_p1 = scmp.eq.s32.totalorder %s166_s17, 0 }
   0xf   : > { %p180_p2 = scmp.eq.s32.totalorder %s1298_s13, 1  ;;  %p185_p3 = scmp.ne.s32.totalorder %s1215_s10, %s1211_s30 }
  0x10   : > { %p186_p4 = scmp.eq.s32.totalorder %s1755_s14, 1  ;;  %p1017_p7 = scmp.ge.s32.totalorder %s1223_s12, 1 }
  0x11   : > { %s1315_s18 = scalar_select %p167_p1, %s1219_s11, %s169_s16  }
  0x12   : > { %p1317_p5 = por %p180_p2, %p179_p0  ;;  %p1321_p6 = por %p186_p4, %p185_p3 }
  0x13   : > { %1763 = sst [smem:[#allocation10_spill]] %s1315_s18  ;;  %p309_p8 = scmp.lt.s32.totalorder %s1223_s12, 3 }
  0x15   : > { %p310_p9 = pnand %p1017_p7, %p309_p8 }
  0x16   : > { %s1766_s2 = sld [smem:[#allocation13_spill]] (!%p310_p9)  ;;  %p364_p10 = scmp.lt.s32.totalorder (!%p310_p9), %s1298_s13, 1 }
  0x17   : > { %313 = sbr.rel (%p310_p9) target bundleno = 797 (0x31d), region = 44  ;;  %s1767_s4 = sld [smem:[#allocation15_spill]] (!%p310_p9) }
  0x18   : > { %s1769_s1 = sld [smem:[#allocation12_spill]] (!%p310_p9)  ;;  %s1121_s16 = scalar_lea.hbm (!%p310_p9), %s1751_s6, 16 }
  0x19   : > { %s1770_s0 = sld [smem:[#allocation11_spill]] (!%p310_p9) }
  0x1a   : > { %s1771_s3 = sld [smem:[#allocation14_spill]] (!%p310_p9) }
  0x1c   : > { %v426_v0 = vld [vmem:[%s1766_s2 + $0x168] sm:$0xff]  ;;  %v423_v2 = vld [vmem:[%s1766_s2 + $0x150] sm:$0xff]  ;;  %v420_v5 = vld [vmem:[%s1766_s2 + $0x138] sm:$0xff]  ;;  %s1428_s21 = scalar_select %p364_p10, %s1298_s13, 1 }
  0x1d   : > { %v542_v1 = vld [vmem:[%s1767_s4 + $0x168] sm:$0xff]  ;;  %437 = vmatpush.msra.mxu0 %v426_v0  ;;  %v539_v3 = vld [vmem:[%s1767_s4 + $0x150] sm:$0xff]  ;;  %v536_v6 = vld [vmem:[%s1767_s4 + $0x138] sm:$0xff] }
  0x1e   : > { %553 = vmatpush.msra.mxu3 %v542_v1  ;;  %v427_v4 = vld [vmem:[%s1766_s2 + $0x170] sm:$0xff]  ;;  %v424_v7 = vld [vmem:[%s1766_s2 + $0x158] sm:$0xff]  ;;  %v421_v8 = vld [vmem:[%s1766_s2 + $0x140] sm:$0xff]  ;;  %s1021_s17 = sshll.u32 %s1428_s21, 3  ;;  %s1768_s25 = sshll.u32 %s1428_s21, 4 }
  0x1f   : > { %457 = vmatpush.msra.mxu1 %v427_v4  ;;  %438 = vmatpush.msra.mxu0 %v423_v2  ;;  %v417_v9 = vld [vmem:[%s1766_s2 + $0x120] sm:$0xff]  ;;  %v418_v11 = vld [vmem:[%s1766_s2 + $0x128] sm:$0xff]  ;;  %v415_v14 = vld [vmem:[%s1766_s2 + $0x110] sm:$0xff]  ;;  %s372_s28 = scalar_lea.vmem %s1769_s1, %s1768_s25  ;;  %s367_s26 = scalar_lea.vmem %s1770_s0, %s1021_s17 }
  0x20   : > { %554 = vmatpush.msra.mxu3 %v539_v3  ;;  %v533_v10 = vld [vmem:[%s1767_s4 + $0x120] sm:$0xff]  ;;  %v414_v12 = vld [vmem:[%s1766_s2 + $0x108] sm:$0xff]  ;;  %v411_v15 = vld [vmem:[%s1766_s2 + $0xf0] sm:$0xff]  ;;  %s1772_s27 = sshll.u32 %s1428_s21, 4  ;;  %s1029_s21 = sshll.u32 %s1298_s13, 3 }
  0x21   : > { %458 = vmatpush.msra.mxu1 %v424_v7  ;;  %439 = vmatpush.msra.mxu0 %v420_v5  ;;  %v530_v13 = vld [vmem:[%s1767_s4 + $0x108] sm:$0xff]  ;;  %v527_v16 = vld [vmem:[%s1767_s4 + $0xf0] sm:$0xff]  ;;  %v412_v17 = vld [vmem:[%s1766_s2 + $0xf8] sm:$0xff]  ;;  %s816_s22 = scalar_lea.hbm %s1751_s6, %s1029_s21 }
  0x22   : > { %555 = vmatpush.msra.mxu3 %v536_v6  ;;  %v408_v18 = vld [vmem:[%s1766_s2 + $0xd8] sm:$0xff]  ;;  %v409_v20 = vld [vmem:[%s1766_s2 + $0xe0] sm:$0xff]  ;;  %v406_v23 = vld [vmem:[%s1766_s2 + $0xc8] sm:$0xff]  ;;  %s820_s24 = sshll.u32 %s816_s22, 4  ;;  %s821_s24 = int_to_ptr.hbm [resolvable:$true] %s820_s24 }
  0x23   : > { %459 = vmatpush.msra.mxu1 %v421_v8  ;;  %440 = vmatpush.msra.mxu0 %v417_v9  ;;  %v524_v19 = vld [vmem:[%s1767_s4 + $0xd8] sm:$0xff]  ;;  %v405_v21 = vld [vmem:[%s1766_s2 + $0xc0] sm:$0xff]  ;;  %v402_v24 = vld [vmem:[%s1766_s2 + $0xa8] sm:$0xff]  ;;  %s1115_s11 = sshra.s32 %s821_s24, 4  ;;  %s1116_s11 = int_to_ptr.hbm [resolvable:$true] %s1115_s11 }
  0x24   : > { %556 = vmatpush.msra.mxu3 %v533_v10  ;;  %v521_v22 = vld [vmem:[%s1767_s4 + $0xc0] sm:$0xff]  ;;  %v518_v25 = vld [vmem:[%s1767_s4 + $0xa8] sm:$0xff]  ;;  %v403_v26 = vld [vmem:[%s1766_s2 + $0xb0] sm:$0xff]  ;;  %s1117_s29 = scalar_lea.hbm %s1116_s11, 8  ;;  %p1122_p0 = scmp.lt.s32.totalorder %s1116_s11, %s1751_s6 }
  0x25   : > { %460 = vmatpush.msra.mxu1 %v418_v11  ;;  %441 = vmatpush.msra.mxu0 %v414_v12  ;;  %v399_v27 = vld [vmem:[%s1766_s2 + $0x90] sm:$0xff]  ;;  %v400_v29 = vld [vmem:[%s1766_s2 + $0x98] sm:$0xff]  ;;  %v397_v32 = vld [vmem:[%s1766_s2 + $0x80] sm:$0xff]  ;;  %p1118_p11 = scmp.ne.s32.totalorder %s1116_s11, %s1117_s29  ;;  %p1123_p1 = scmp.lt.s32.totalorder %s1121_s16, %s1117_s29 }
  0x26   : > { %557 = vmatpush.msra.mxu3 %v530_v13  ;;  %v515_v28 = vld [vmem:[%s1767_s4 + $0x90] sm:$0xff]  ;;  %v396_v30 = vld [vmem:[%s1766_s2 + $0x78] sm:$0xff]  ;;  %v393_v33 = vld [vmem:[%s1766_s2 + $0x60] sm:$0xff] }
  0x27   : > { %461 = vmatpush.msra.mxu1 %v415_v14  ;;  %442 = vmatpush.msra.mxu0 %v411_v15  ;;  %v512_v31 = vld [vmem:[%s1767_s4 + $0x78] sm:$0xff]  ;;  %v509_v34 = vld [vmem:[%s1767_s4 + $0x60] sm:$0xff]  ;;  %v394_v35 = vld [vmem:[%s1766_s2 + $0x68] sm:$0xff]  ;;  %p1119_p12 = pnand %p1118_p11, %p1317_p5  ;;  %p1124_p2 = por %p1123_p1, %p1122_p0 }
  0x28   : > { %558 = vmatpush.msra.mxu3 %v527_v16  ;;  %v390_v36 = vld [vmem:[%s1766_s2 + $0x48] sm:$0xff]  ;;  %v391_v38 = vld [vmem:[%s1766_s2 + $0x50] sm:$0xff]  ;;  %v388_v41 = vld [vmem:[%s1766_s2 + $0x38] sm:$0xff] }
  0x29   : > { %462 = vmatpush.msra.mxu1 %v412_v17  ;;  %443 = vmatpush.msra.mxu0 %v408_v18  ;;  %v506_v37 = vld [vmem:[%s1767_s4 + $0x48] sm:$0xff]  ;;  %v387_v39 = vld [vmem:[%s1766_s2 + $0x30] sm:$0xff]  ;;  %v384_v42 = vld [vmem:[%s1766_s2 + $0x18] sm:$0xff]  ;;  %p1120_p13 = pneg %p1119_p12 }
  0x2a   : > { %559 = vmatpush.msra.mxu3 %v524_v19  ;;  %v503_v40 = vld [vmem:[%s1767_s4 + $0x30] sm:$0xff]  ;;  %v500_v43 = vld [vmem:[%s1767_s4 + $0x18] sm:$0xff]  ;;  %v385_v44 = vld [vmem:[%s1766_s2 + $0x20] sm:$0xff] }
  0x2b   : > { %463 = vmatpush.msra.mxu1 %v409_v20  ;;  %444 = vmatpush.msra.mxu0 %v405_v21  ;;  %v381_v45 = vld [vmem:[%s1766_s2] sm:$0xff]  ;;  %v543_v48 = vld [vmem:[%s1767_s4 + $0x170] sm:$0xff]  ;;  %v382_v49 = vld [vmem:[%s1766_s2 + $0x8] sm:$0xff]  ;;  %p1125_p3 = pnand %p1124_p2, %p1120_p13 }
  0x2c   : > { %560 = vmatpush.msra.mxu3 %v521_v22  ;;  %v497_v46 = vld [vmem:[%s1767_s4] sm:$0xff]  ;;  %v540_v50 = vld [vmem:[%s1767_s4 + $0x158] sm:$0xff]  ;;  %v534_v53 = vld [vmem:[%s1767_s4 + $0x128] sm:$0xff] }
  0x2d   : > { %464 = vmatpush.msra.mxu1 %v406_v23  ;;  %445 = vmatpush.msra.mxu0 %v402_v24  ;;  %v1482_v47 = vld [vmem:[%s372_s28] sm:$0xff]  ;;  %v1504_v54 = vld [vmem:[%s372_s28 + $0x8] sm:$0xff]  ;;  %v531_v55 = vld [vmem:[%s1767_s4 + $0x110] sm:$0xff]  ;;  %s377_s28 = scalar_lea.vmem %s1754_s9, %s1772_s27 }
  0x2e   : > { %561 = vmatpush.msra.mxu3 %v518_v25  ;;  %v1493_v51 = vld [vmem:[%s367_s26] sm:$0xff]  ;;  %v528_v56 = vld [vmem:[%s1767_s4 + $0xf8] sm:$0xff]  ;;  %v522_v58 = vld [vmem:[%s1767_s4 + $0xc8] sm:$0xff]  ;;  %s1651_s26 = sand.u32 1, %s1215_s10  }
  0x2f   : > { %465 = vmatpush.msra.mxu1 %v403_v26  ;;  %446 = vmatpush.msra.mxu0 %v399_v27  ;;  %v537_v52 = vld [vmem:[%s1767_s4 + $0x140] sm:$0xff]  ;;  %v519_v59 = vld [vmem:[%s1767_s4 + $0xb0] sm:$0xff]  ;;  %v516_v60 = vld [vmem:[%s1767_s4 + $0x98] sm:$0xff]  ;;  %s1018_s25 = sshll.u32 %s1651_s26, 3  ;;  %s791_s27 = scalar_lea.sflag [#allocation3], %s1651_s26 }
  0x30   : > { %562 = vmatpush.msra.mxu3 %v515_v28  ;;  %v525_v57 = vld [vmem:[%s1767_s4 + $0xe0] sm:$0xff]  ;;  %v510_v62 = vld [vmem:[%s1767_s4 + $0x68] sm:$0xff]  ;;  %v507_v63 = vld [vmem:[%s1767_s4 + $0x50] sm:$0xff]  ;;  %s1656_s18 = scalar_lea.vmem [#allocation6], %s1018_s25  ;;  %s342_s23 = scalar_lea.vmem [#allocation2], %s1018_s25 }
  0x31   : > { %466 = vmatpush.msra.mxu1 %v400_v29  ;;  %447 = vmatpush.msra.mxu0 %v396_v30  ;;  %v513_v61 = vld [vmem:[%s1767_s4 + $0x80] sm:$0xff]  ;;  %v504_v0 = vld [vmem:[%s1767_s4 + $0x38] sm:$0xff]  ;;  %v498_v2 = vld [vmem:[%s1767_s4 + $0x8] sm:$0xff]  ;;  %s818_s14 = sshll.u32 %s342_s23, 4  ;;  %s819_s14 = int_to_ptr.vmem [resolvable:$true] %s818_s14 }
  0x32   : > { %563 = vmatpush.msra.mxu3 %v512_v31  ;;  %v501_v1 = vld [vmem:[%s1767_s4 + $0x20] sm:$0xff]  ;;  %v544_v3 = vld [vmem:[%s1767_s4 + $0x178] sm:$0xff]  ;;  %v538_v5 = vld [vmem:[%s1767_s4 + $0x148] sm:$0xff] }
  0x33   : > { %467 = vmatpush.msra.mxu1 %v397_v32  ;;  %448 = vmatpush.msra.mxu0 %v393_v33  ;;  %v541_v4 = vld [vmem:[%s1767_s4 + $0x160] sm:$0xff]  ;;  %v428_v6 = vld [vmem:[%s1766_s2 + $0x178] sm:$0xff]  ;;  %v535_v8 = vld [vmem:[%s1767_s4 + $0x130] sm:$0xff] }
  0x34   : > { %564 = vmatpush.msra.mxu3 %v509_v34  ;;  %v425_v7 = vld [vmem:[%s1766_s2 + $0x160] sm:$0xff]  ;;  %477 = vmatpush.msra.mxu2 %v428_v6  ;;  %v422_v9 = vld [vmem:[%s1766_s2 + $0x148] sm:$0xff]  ;;  %v532_v10 = vld [vmem:[%s1767_s4 + $0x118] sm:$0xff] }
  0x35   : > { %468 = vmatpush.msra.mxu1 %v394_v35  ;;  %449 = vmatpush.msra.mxu0 %v390_v36  ;;  %v529_v11 = vld [vmem:[%s1767_s4 + $0x100] sm:$0xff]  ;;  %v419_v12 = vld [vmem:[%s1766_s2 + $0x130] sm:$0xff]  ;;  %v526_v13 = vld [vmem:[%s1767_s4 + $0xe8] sm:$0xff] }
  0x36   : > { %565 = vmatpush.msra.mxu3 %v506_v37  ;;  %478 = vmatpush.msra.mxu2 %v425_v7  ;;  %v416_v14 = vld [vmem:[%s1766_s2 + $0x118] sm:$0xff]  ;;  %v413_v15 = vld [vmem:[%s1766_s2 + $0x100] sm:$0xff]  ;;  %v523_v16 = vld [vmem:[%s1767_s4 + $0xd0] sm:$0xff] }
  0x37   : > { %469 = vmatpush.msra.mxu1 %v391_v38  ;;  %450 = vmatpush.msra.mxu0 %v387_v39  ;;  %v520_v17 = vld [vmem:[%s1767_s4 + $0xb8] sm:$0xff]  ;;  %v410_v18 = vld [vmem:[%s1766_s2 + $0xe8] sm:$0xff]  ;;  %v517_v19 = vld [vmem:[%s1767_s4 + $0xa0] sm:$0xff] }
  0x38   : > { %566 = vmatpush.msra.mxu3 %v503_v40  ;;  %479 = vmatpush.msra.mxu2 %v422_v9  ;;  %v407_v20 = vld [vmem:[%s1766_s2 + $0xd0] sm:$0xff]  ;;  %v514_v21 = vld [vmem:[%s1767_s4 + $0x88] sm:$0xff]  ;;  %v404_v22 = vld [vmem:[%s1766_s2 + $0xb8] sm:$0xff] }
  0x39   : > { %470 = vmatpush.msra.mxu1 %v388_v41  ;;  %451 = vmatpush.msra.mxu0 %v384_v42  ;;  %v511_v23 = vld [vmem:[%s1767_s4 + $0x70] sm:$0xff]  ;;  %v401_v24 = vld [vmem:[%s1766_s2 + $0xa0] sm:$0xff]  ;;  %v508_v25 = vld [vmem:[%s1767_s4 + $0x58] sm:$0xff] }
  0x3a   : > { %567 = vmatpush.msra.mxu3 %v500_v43  ;;  %480 = vmatpush.msra.mxu2 %v419_v12  ;;  %v398_v26 = vld [vmem:[%s1766_s2 + $0x88] sm:$0xff]  ;;  %v429_v27 = vld [vmem:[%s1771_s3] sm:$0x7]  ;;  %v395_v30 = vld [vmem:[%s1766_s2 + $0x70] sm:$0xff] }
  0x3b   : > { %471 = vmatpush.msra.mxu1 %v385_v44  ;;  %452 = vmatpush.msra.mxu0 %v381_v45  ;;  %v505_v28 = vld [vmem:[%s1767_s4 + $0x40] sm:$0xff]  ;;  %v432_v29 = vperm.slane %v429_v27, 1  ;;  %v392_v32 = vld [vmem:[%s1766_s2 + $0x58] sm:$0xff]  ;;  %v502_v33 = vld [vmem:[%s1767_s4 + $0x28] sm:$0xff] }
  0x3c   : > { %568 = vmatpush.msra.mxu3 %v497_v46  ;;  %453 = vmatmul.f32.vlgmr.msra.gmra.mxu0 %v1493_v51  ;;  %v545_v31 = vld [vmem:[%s1750_s5] sm:$0x7]  ;;  %v499_v35 = vld [vmem:[%s1767_s4 + $0x10] sm:$0xff]  ;;  %v386_v39 = vld [vmem:[%s1766_s2 + $0x28] sm:$0xff] }
  0x3d   : > { %569 = vmatmul.f32.vlgmr.msra.gmra.mxu3 %v1482_v47  ;;  %576 = vmatpush.msrb.mxu0 %v543_v48  ;;  %v389_v34 = vld [vmem:[%s1766_s2 + $0x40] sm:$0xff]  ;;  %v547_v38 = vperm.slane %v545_v31, 0  ;;  %v383_v42 = vld [vmem:[%s1766_s2 + $0x10] sm:$0xff] }
  0x3e   : > { %472 = vmatpush.msra.mxu1 %v382_v49  ;;  %481 = vmatpush.msra.mxu2 %v416_v14 }
  0x3f   : > { %577 = vmatpush.msrb.mxu0 %v540_v50  ;;  %473 = vmatmul.f32.vlgmr.msra.gmra.mxu1 %v1493_v51  ;;  %v431_v50 = vperm.slane %v429_v27, 0 }
  0x40   : > { %599 = vmatpush.msrb.mxu1 %v544_v3  ;;  %482 = vmatpush.msra.mxu2 %v413_v15 }
  0x41   : > { %578 = vmatpush.msrb.mxu0 %v537_v52 }
  0x42   : > { %600 = vmatpush.msrb.mxu1 %v541_v4  ;;  %483 = vmatpush.msra.mxu2 %v410_v18 }
  0x43   : > { %579 = vmatpush.msrb.mxu0 %v534_v53 }
  0x44   : > { %601 = vmatpush.msrb.mxu1 %v538_v5  ;;  %484 = vmatpush.msra.mxu2 %v407_v20 }
  0x45   : > { %572 = vmatmul.f32.gmra.mxu3 %v1504_v54  ;;  %580 = vmatpush.msrb.mxu0 %v531_v55 }
  0x46   : > { %602 = vmatpush.msrb.mxu1 %v535_v8  ;;  %485 = vmatpush.msra.mxu2 %v404_v22 }
  0x47   : > { %581 = vmatpush.msrb.mxu0 %v528_v56  ;;  %v549_v56 = vperm.slane %v545_v31, 2 }
  0x48   : > { %603 = vmatpush.msrb.mxu1 %v532_v10  ;;  %486 = vmatpush.msra.mxu2 %v401_v24 }
  0x49   : > { %582 = vmatpush.msrb.mxu0 %v525_v57 }
  0x4a   : > { %604 = vmatpush.msrb.mxu1 %v529_v11  ;;  %487 = vmatpush.msra.mxu2 %v398_v26 }
  0x4b   : > { %583 = vmatpush.msrb.mxu0 %v522_v58 }
  0x4c   : > { %605 = vmatpush.msrb.mxu1 %v526_v13  ;;  %488 = vmatpush.msra.mxu2 %v395_v30 }
  0x4d   : > { %584 = vmatpush.msrb.mxu0 %v519_v59 }
  0x4e   : > { %606 = vmatpush.msrb.mxu1 %v523_v16  ;;  %489 = vmatpush.msra.mxu2 %v392_v32 }
  0x4f   : > { %585 = vmatpush.msrb.mxu0 %v516_v60  ;;  %v643_v60 = vlaneseq }
  0x50   : > { %607 = vmatpush.msrb.mxu1 %v520_v17  ;;  %490 = vmatpush.msra.mxu2 %v389_v34 }
  0x51   : > { %586 = vmatpush.msrb.mxu0 %v513_v61 }
  0x52   : > { %608 = vmatpush.msrb.mxu1 %v517_v19  ;;  %491 = vmatpush.msra.mxu2 %v386_v39 }
  0x53   : > { %587 = vmatpush.msrb.mxu0 %v510_v62 }
  0x54   : > { %609 = vmatpush.msrb.mxu1 %v514_v21  ;;  %492 = vmatpush.msra.mxu2 %v383_v42 }
  0x55   : > { %588 = vmatpush.msrb.mxu0 %v507_v63  ;;  %493 = vmatmul.f32.vlgmr.msra.gmra.mxu2 %v1493_v51  ;;  %v433_v51 = vperm.slane %v429_v27, 2  ;;  %v644_v63 = vand.u32 127, %v643_v60 }
  0x56   : > { %610 = vmatpush.msrb.mxu1 %v511_v23 }
  0x57   : > { %589 = vmatpush.msrb.mxu0 %v504_v0  ;;  %vm716_vm0 = vcmp.lt.s32.totalorder %v644_v63, 8  ;;  %vm645_vm1 = vcmp.lt.s32.totalorder %v644_v63, 16 }
  0x58   : > { %611 = vmatpush.msrb.mxu1 %v508_v25 }
  0x59   : > { %590 = vmatpush.msrb.mxu0 %v501_v1 }
  0x5a   : > { %612 = vmatpush.msrb.mxu1 %v505_v28 }
  0x5b   : > { %591 = vmatpush.msrb.mxu0 %v498_v2 }
  0x5c   : > { %592 = vmatmul.f32.vlgmr.msrb.gmra.mxu0 %v1482_v47  ;;  %613 = vmatpush.msrb.mxu1 %v502_v33 }
  0x5e   : > { %614 = vmatpush.msrb.mxu1 %v499_v35 }
  0x5f   : > { %615 = vmatmul.f32.vlgmr.msrb.gmra.mxu1 %v1482_v47  ;;  %v548_v47 = vperm.slane %v545_v31, 1 }
  0x64   : > { %595 = vmatmul.f32.gmra.mxu0 %v1504_v54 }
  0x67   : > { %618 = vmatmul.f32.gmra.mxu1 %v1504_v54 }
  0xb9   : > { %v454_v45 = vpop.f32.mrf.mxu0 }
  0xba   : > { %v455_v53 = vadd.f32 %v454_v45, %v431_v50 }
  0xbc   : > { %v474_v36 = vpop.f32.mrf.mxu1 }
  0xbd   : > { %v475_v37 = vadd.f32 %v474_v36, %v432_v29 }
  0xbf   : > { %706 = vmatpush.xpose.msrb.mxu3 %v475_v37 }
  0xc0   : > { %v570_v40 = vpop.f32.mrf.mxu3 }
  0xc1   : > { %v571_v41 = vadd.f32 %v570_v40, %v547_v38 }
  0xc3   : > { %707 = vmatmul.f32.vlgmr.msrb.gmra.mxu3 %v571_v41 }
  0xc8   : > { %v573_v43 = vpop.f32.mrf.mxu3 }
  0xc9   : > { %v574_v44 = vadd.f32 %v573_v43, %v547_v38 }
  0xcb   : > { %710 = vmatmul.f32.gmra.mxu3 %v574_v44 }
  0xd8   : > { %v494_v61 = vpop.f32.mrf.mxu2 }
  0xd9   : > { %v593_v46 = vpop.f32.mrf.mxu0  ;;  %v495_v62 = vadd.f32 %v494_v61, %v433_v51 }
  0xda   : > { %v594_v52 = vadd.f32 %v593_v46, %v548_v47 }
  0xdc   : > { %v616_v55 = vpop.f32.mrf.mxu1 }
  0xdd   : > { %v617_v58 = vadd.f32 %v616_v55, %v549_v56 }
  0xe1   : > { %v596_v48 = vpop.f32.mrf.mxu0 }
  0xe2   : > { %v597_v49 = vadd.f32 %v596_v48, %v548_v47 }
  0xe4   : > { %636 = vmatpush.xpose.msrb.mxu2 %v597_v49  ;;  %v619_v57 = vpop.f32.mrf.mxu1 }
  0xe5   : > { %v620_v54 = vadd.f32 %v619_v57, %v549_v56 }
  0xe8   : > { %637 = vmatpush.xpose.msrb.mxu2 %v594_v52 }
  0xeb   : > { %638 = vmatmul.f32.vlgmr.msrb.gmra.mxu2 %v455_v53 }
  0xec   : > { %683 = vmatpush.msra.mxu2 %v620_v54 }
  0xee   : > { %684 = vmatpush.msra.mxu2 %v617_v58 }
  0xf0   : > { %778 = vmatpush.msrb.mxu2 %v495_v62 }
 0x146   : > { %v708_v59 = vpop.f32.mrf.mxu3 }
 0x147   : > { %v714_v6 = vmul.f32 0.17677669, %v708_v59 }
 0x149   : > { %v717_v7 = vsel %vm716_vm0, %v714_v6, -inf }
 0x14e   : > { %v711_v0 = vpop.f32.mrf.mxu3 }
 0x14f   : > { %v715_v1 = vmul.f32 0.17677669, %v711_v0 }
 0x151   : > { %v718_v2 = vsel %vm716_vm0, %v715_v1, -inf }
 0x152   : > { %721 = vmax.xlane.f32.xlu1 %v718_v2 }
 0x16e   : > { %v639_v3 = vpop.f32.mrf.mxu2 }
 0x16f   : > { %v642_v4 = vmul.f32 0.17677669, %v639_v3 }
 0x171   : > { %v646_v5 = vsel %vm645_vm1, %v642_v4, -inf }
 0x172   : > { %647 = vmax.xlane.f32.xlu0 %v646_v5 }
 0x17a   : > { %719 = vmax.xlane.f32.xlu0 %v717_v7 }
 0x1c5   : > { %v722_v13 = vpop.xlane.xlu1 %721 }
 0x1c6   : > { %v724_v16 = vsub.f32 %v718_v2, %v722_v13 }
 0x1c8   : > { %v727_v17 = vmul.f32 1.442695, %v724_v16 }
 0x1e5   : > { %v648_v8 = vpop.xlane.xlu0 %647 }
 0x1e6   : > { %v649_v9 = vsub.f32 %v646_v5, %v648_v8 }
 0x1e8   : > { %v650_v10 = vmul.f32 1.442695, %v649_v9 }
 0x1ea   : > { %1089 = vpow2.f32 %v650_v10 }
 0x1ed   : > { %v720_v11 = vpop.xlane.xlu0 %719 }
 0x1ee   : > { %v723_v12 = vsub.f32 %v717_v7, %v720_v11 }
 0x1f0   : > { %v1090_v14 = vpop.eup %1089  ;;  %v725_v15 = vmul.f32 1.442695, %v723_v12 }
 0x1f1   : > { %652 = vadd.xlane.f32.xlu1 %v1090_v14 }
 0x1f2   : > { %1091 = vpow2.f32 %v725_v15 }
 0x1f3   : > { %1093 = vpow2.f32 %v727_v17 }
 0x1f8   : > { %v1092_v18 = vpop.eup %1091 }
 0x1f9   : > { %729 = vadd.xlane.f32.xlu2 %v1092_v18  ;;  %v1094_v19 = vpop.eup %1093 }
 0x201   : > { %731 = vadd.xlane.f32.xlu2 %v1094_v19 }
 0x264   : > { %v653_v20 = vpop.xlane.xlu1 %652 }
 0x265   : > { %1095 = vrcp.f32 %v653_v20  ;;  %v665_v25 = vand.u32 2147483648, %v653_v20  ;;  %v663_v27 = vand.u32 2147483647, %v653_v20  ;;  %vm659_vm3 = vweird.f32 %v653_v20 }
 0x267   : > { %v666_v30 = vor.u32 1.1754944e-38, %v665_v25  ;;  %vm664_vm5 = vcmp.eq.f32.partialorder %v663_v27, 8.507059e+37 }
 0x26b   : > { %v1096_v21 = vpop.eup %1095 }
 0x26c   : > { %v655_v22 = vmul.f32 %v1096_v21, %v653_v20  ;;  %v730_v23 = vpop.xlane.xlu2 %729  ;;  %vm660_vm2 = vweird.f32 %v1096_v21 }
 0x26d   : > { %1097 = vrcp.f32 %v730_v23  ;;  %vm661_vm4 = vmor %vm659_vm3, %vm660_vm2  ;;  %v744_v37 = vand.u32 2147483648, %v730_v23  ;;  %v742_v39 = vand.u32 2147483647, %v730_v23  ;;  %vm738_vm7 = vweird.f32 %v730_v23 }
 0x26e   : > { %v656_v24 = vsub.f32 1.0, %v655_v22 }
 0x26f   : > { %v745_v42 = vor.u32 1.1754944e-38, %v744_v37  ;;  %vm743_vm9 = vcmp.eq.f32.partialorder %v742_v39, 8.507059e+37 }
 0x270   : > { %v657_v26 = vmul.f32 %v1096_v21, %v656_v24 }
 0x272   : > { %v658_v28 = vadd.f32 %v1096_v21, %v657_v26 }
 0x273   : > { %v1098_v29 = vpop.eup %1097 }
 0x274   : > { %v662_v31 = vsel %vm661_vm4, %v1096_v21, %v658_v28  ;;  %v734_v32 = vmul.f32 %v1098_v29, %v730_v23  ;;  %v732_v33 = vpop.xlane.xlu2 %731  ;;  %vm739_vm6 = vweird.f32 %v1098_v29 }
 0x275   : > { %1099 = vrcp.f32 %v732_v33  ;;  %v667_v34 = vsel %vm664_vm5, %v666_v30, %v662_v31  ;;  %vm740_vm8 = vmor %vm738_vm7, %vm739_vm6  ;;  %v759_v48 = vand.u32 2147483648, %v732_v33  ;;  %v757_v50 = vand.u32 2147483647, %v732_v33 }
 0x276   : > { %v735_v35 = vsub.f32 1.0, %v734_v32  ;;  %v668_v36 = vmul.f32 %v1090_v14, %v667_v34  ;;  %vm753_vm11 = vweird.f32 %v732_v33 }
 0x277   : > { %v760_v53 = vor.u32 1.1754944e-38, %v759_v48  ;;  %vm758_vm13 = vcmp.eq.f32.partialorder %v757_v50, 8.507059e+37 }
 0x278   : > { %v736_v38 = vmul.f32 %v1098_v29, %v735_v35  ;;  %685 = vmatmul.f32.vlgmr.msra.gmra.mxu2 %v668_v36  ;;  %689 = vst [vmem:[%s1656_s18] sm:$0xff] %v668_v36 }
 0x27a   : > { %v737_v40 = vadd.f32 %v1098_v29, %v736_v38 }
 0x27b   : > { %v1100_v41 = vpop.eup %1099 }
 0x27c   : > { %v749_v43 = vmul.f32 %v1100_v41, %v732_v33  ;;  %v741_v44 = vsel %vm740_vm8, %v1098_v29, %v737_v40  ;;  %vm754_vm10 = vweird.f32 %v1100_v41 }
 0x27d   : > { %v746_v45 = vsel %vm743_vm9, %v745_v42, %v741_v44  ;;  %vm755_vm12 = vmor %vm753_vm11, %vm754_vm10 }
 0x27e   : > { %v750_v46 = vsub.f32 1.0, %v749_v43  ;;  %v747_v47 = vmul.f32 %v1092_v18, %v746_v45 }
 0x280   : > { %v751_v49 = vmul.f32 %v1100_v41, %v750_v46  ;;  %779 = vmatmul.f32.vlgmr.msrb.gmra.mxu2 %v747_v47  ;;  %786 = vst [vmem:[%s377_s28] sm:$0xff] %v747_v47 }
 0x282   : > { %v752_v52 = vadd.f32 %v1100_v41, %v751_v49 }
 0x284   : > { %v756_v55 = vsel %vm755_vm12, %v1100_v41, %v752_v52 }
 0x285   : > { %v761_v56 = vsel %vm758_vm13, %v760_v53, %v756_v55 }
 0x286   : > { %v762_v57 = vmul.f32 %v1094_v19, %v761_v56 }
 0x288   : > { %782 = vmatmul.f32.gmra.mxu2 %v762_v57  ;;  %787 = vst [vmem:[%s377_s28 + $0x8] sm:$0xff] %v762_v57 }
 0x2fb   : > { %v686_v51 = vpop.f32.mrf.mxu2 }
 0x2fc   : > { %690 = vst [vmem:[%s342_s23] sm:$0xff] %v686_v51 }
 0x2fd   : > { %1128 = shalt.err (!%p1125_p3)
}
 0x2fe   : > { %1038 = dma.vmem_to_hbm [thread:$0]  (%p1317_p5), %s819_s14, 128, %s821_s24, %s791_s27  }
 0x2ff   : > { %s1019_s22 = sshll.u32 %s1651_s26, 4  ;;  %s1037_s23 = sshll.u32 %s1298_s13, 4 }
 0x300   : > { %s831_s17 = scalar_lea.hbm %s1752_s7, %s1037_s23  ;;  %s349_s11 = scalar_lea.vmem [#allocation4], %s1019_s22 }
 0x301   : > { %s832_s29 = sshll.u32 %s349_s11, 4  ;;  %s847_s1 = scalar_lea.hbm %s1753_s8, %s1029_s21  ;;  %s833_s29 = int_to_ptr.vmem [resolvable:$true] %s832_s29 }
 0x302   : > { %s795_s2 = sand.u32 1, %s1298_s13   ;;  %s834_s3 = sshll.u32 %s831_s17, 4  ;;  %s835_s3 = int_to_ptr.hbm [resolvable:$true] %s834_s3 }
 0x303   : > { %v780_v58 = vpop.f32.mrf.mxu2  ;;  %s849_s4 = sshll.u32 %s1656_s18, 4  ;;  %s851_s26 = sshll.u32 %s847_s1, 4  ;;  %s1695_s4 = int_to_ptr.vmem [resolvable:$true] %s849_s4  ;;  %s1697_s26 = int_to_ptr.hbm [resolvable:$true] %s851_s26 }
 0x304   : > { %788 = vst [vmem:[%s349_s11] sm:$0xff] %v780_v58  ;;  %s1699_s14 = scalar_lea.sflag [#allocation5], %s795_s2  ;;  %s1143_s24 = sshra.s32 %s835_s3, 4  ;;  %s1144_s24 = int_to_ptr.hbm [resolvable:$true] %s1143_s24 }
 0x305   : > { %s1145_s27 = scalar_lea.hbm %s1144_s24, 16  ;;  %s1149_s1 = scalar_lea.hbm %s1752_s7, 32 }
 0x306   : > { %p1146_p4 = scmp.ne.s32.totalorder %s1144_s24, %s1145_s27  ;;  %p1150_p9 = scmp.lt.s32.totalorder %s1144_s24, %s1752_s7 }
 0x307   : > { %p1151_p10 = scmp.lt.s32.totalorder %s1149_s1, %s1145_s27 }
 0x308   : > { %p1147_p7 = pnand %p1146_p4, %p1317_p5 }
 0x309   : > { %p1152_p11 = por %p1151_p10, %p1150_p9 }
 0x30a   : > { %p1148_p8 = pneg %p1147_p7 }
 0x30b   : > { %v783_v54 = vpop.f32.mrf.mxu2 }
 0x30c   : > { %789 = vst [vmem:[%s349_s11 + $0x8] sm:$0xff] %v783_v54  ;;  %p1153_p12 = pnand %p1152_p11, %p1148_p8 }
 0x30e   : > { %1156 = shalt.err (!%p1153_p12)
}
 0x30f   : > { %s1225_s2 = smov 128   ;;  %s1226_s23 = smov 8  }
 0x310   : > { %1039 = dma.vmem_to_hbm [thread:$0]  (%p1317_p5), %s833_s29, 256, %s835_s3, %s1699_s14, %s1225_s2, %s1225_s2, %s1226_s23  }
 0x311   : > { %s1171_s0 = sshra.s32 %s1697_s26, 4  ;;  %s1177_s16 = scalar_lea.hbm %s1753_s8, 16  ;;  %s1172_s0 = int_to_ptr.hbm [resolvable:$true] %s1171_s0 }
 0x312   : > { %s1173_s28 = scalar_lea.hbm %s1172_s0, 8  ;;  %p1178_p2 = scmp.lt.s32.totalorder %s1172_s0, %s1753_s8 }
 0x313   : > { %p1174_p13 = scmp.ne.s32.totalorder %s1172_s0, %s1173_s28  ;;  %p1179_p3 = scmp.lt.s32.totalorder %s1177_s16, %s1173_s28 }
 0x315   : > { %p1175_p0 = pnand %p1174_p13, %p1317_p5  ;;  %p1180_p4 = por %p1179_p3, %p1178_p2 }
 0x317   : > { %p1176_p1 = pneg %p1175_p0 }
 0x319   : > { %p1181_p7 = pnand %p1180_p4, %p1176_p1 }
 0x31b   : > { %1184 = shalt.err (!%p1181_p7)
}
 0x31c   : > { %1040 = dma.vmem_to_hbm [thread:$0]  (%p1317_p5), %s1695_s4, 128, %s1697_s26, %s1699_s14  }
 0x31d PF: > { %p1054_p8 = scmp.ge.s32.totalorder %s1223_s12, 2  ;;  %s866_s3 = sand.u32 1, %s1211_s30  }
 0x31e   : > { %s867_s29 = scalar_lea.sflag [#allocation3], %s866_s3 }
 0x31f   : > { %p1045_p9 = pnand %p1054_p8, %p1321_p6 }
 0x321   : > { %p1046_p10 = pneg %p1045_p9 }
 0x323   : > { %1202 = dma.done.wait (%p1046_p10), %s867_s29, 128  }
 0x324   : > { %1204 = vsyncadd (%p1046_p10), %s867_s29, 4294967168  ;;  %s1773_s27 = sadd.s32 4294967294, %s1223_s12  }
 0x325   : > { %s876_s13 = sand.u32 1, %s1773_s27  }
 0x326   : > { %s877_s19 = scalar_lea.sflag [#allocation5], %s876_s13 }
 0x327   : > { %1206 = dma.done.wait (%p1046_p10), %s877_s19, 384  }
 0x328   : > { %1208 = vsyncadd (%p1046_p10), %s877_s19, 4294966912  ;;  %s1774_s4 = sld [smem:[#allocation9_spill]]  ;;  %p23_p5 = scmp.ge.s32.totalorder %s1302_s15, 4  }
 0x329   : > { %s1775_s11 = sld [smem:[#allocation10_spill]]  ;;  %s1776_s30 = smov %s1215_s10 }
 0x32a   : > { %s1778_s12 = smov %s1302_s15  ;;  %25 = sbr.rel (!%p23_p5) target bundleno = 11 (0xb), region = 126 }
 0x32e   : > { %s1777_s10 = smov %s1774_s4 }
 0x32f   :  { %901 = vsyncpa [#allocation3], 1 }
 0x330   :  { %903 = vsyncpa [#allocation3 + $0x1], 1 }
 0x331   :  { %904 = vsyncpa [#allocation5], 1 }
 0x332   :  { %906 = vsyncpa [#allocation5 + $0x1], 1 }

</bundles_post_ra>
